<compile_context>
chip_gen: v6e
topology: v6e:2x2x1
jax: 0.10.0
libtpu: 0.0.40
codegen_flags: <defaults>
</compile_context>

<pallas_src>
import functools

import jax
import jax.numpy as jnp
from jax.experimental import pallas as pl
from jax.experimental.pallas import tpu as pltpu


def _round_up(n, m):
    return (n + m - 1) // m * m


def _bridge_kernel(x_ref, w1_ref, b1_ref, w2_ref, b2_ref, o_ref):
    """Fused MLP: (ReLU(x @ W1 + b1)) @ W2 + b2 for one row-tile of x.

    x/W1/W2 are bf16 (MXU-native), accumulation + bias + ReLU in f32.
    """
    x = x_ref[...]                                                   # (tm, D) bf16
    h = jnp.dot(x, w1_ref[...], preferred_element_type=jnp.float32)  # (tm, H) f32
    h = jnp.maximum(h + b1_ref[...], 0.0)                            # bias + ReLU in f32
    # TODO(synk): for multi-thousand H, chunk the H axis here (partial h ->
    # ReLU -> accumulate into a y scratch) to bound the live intermediate.
    y = jnp.dot(h.astype(w2_ref.dtype), w2_ref[...],
                preferred_element_type=jnp.float32)                  # (tm, Lp) f32
    y = y + b2_ref[...]
    o_ref[...] = y.astype(o_ref.dtype)


@functools.partial(jax.jit, static_argnames=("tm",))
def _bridge_mlp_2d(x2d, w1, b1, w2, b2, *, tm=256):
    """ReLU(x2d @ W1 + b1) @ W2 + b2 via a single fused Pallas kernel.

    x2d: (M, D)   w1: (D, H)  b1: (H,)   w2: (H, L)  b2: (L,)
    returns: (M, L) in x2d.dtype
    """
    M, D = x2d.shape
    H = w1.shape[1]
    L = w2.shape[1]
    out_dtype = x2d.dtype
    out_itemsize = jnp.dtype(out_dtype).itemsize
    compute_dtype = jnp.bfloat16      # MXU-native inputs, f32 accumulation

    # Row tile: multiple of 16 (bf16 sublane packing); never bigger than the
    # padded row count so tiny inputs don't over-pad.
    tm_eff = max(16, _round_up(min(tm, _round_up(M, 16)), 16))
    M_pad = _round_up(M, tm_eff)

    # Lane-dense output: pad L up to a multiple of 128.
    L_pad = _round_up(L, 128)

    # Prepare (padded) operands.
    x_c = x2d.astype(compute_dtype)
    if M_pad != M:
        x_c = jnp.pad(x_c, ((0, M_pad - M), (0, 0)))
    w1_c = w1.astype(compute_dtype)
    b1_c = b1.astype(jnp.float32).reshape(1, H)
    w2_c = w2.astype(compute_dtype)
    b2_c = b2.astype(jnp.float32).reshape(1, L)
    if L_pad != L:
        w2_c = jnp.pad(w2_c, ((0, 0), (0, L_pad - L)))
        b2_c = jnp.pad(b2_c, ((0, 0), (0, L_pad - L)))

    grid_m = M_pad // tm_eff

    # Advisory cost estimate for XLA scheduling around the kernel.
    flops = 2 * M_pad * (D * H + H * L_pad)
    bytes_accessed = (
        M_pad * D * 2                      # x (bf16)
        + D * H * 2 + H * L_pad * 2        # weights (bf16)
        + (H + L_pad) * 4                  # biases (f32)
        + M_pad * L_pad * out_itemsize     # output
    )
    cost = pl.CostEstimate(flops=flops, transcendentals=0,
                           bytes_accessed=bytes_accessed)

    # Explicit VMEM budget: double-buffered x/out tiles + resident weights
    # (double-buffered by default pipelining) + f32 intermediates, with margin.
    # TODO(synk): on v7x, additionally single-buffer the constant weight blocks
    # (pipeline_mode=pl.Buffered(1)) and L-tile W2 if it still doesn't fit.
    weight_vmem = 2 * (D * H * 2 + H * L_pad * 2 + H * 4 + L_pad * 4)
    io_vmem = 2 * (tm_eff * D * 2) + 2 * (tm_eff * L_pad * out_itemsize)
    inter_vmem = tm_eff * H * 4 + tm_eff * L_pad * 4
    vmem_needed = weight_vmem + io_vmem + inter_vmem
    vmem_limit = int(min(max(2 * vmem_needed, 32 * 1024 * 1024),
                         64 * 1024 * 1024))

    out2d = pl.pallas_call(
        _bridge_kernel,
        out_shape=jax.ShapeDtypeStruct((M_pad, L_pad), out_dtype),
        grid_spec=pltpu.PrefetchScalarGridSpec(
            num_scalar_prefetch=0,
            grid=(grid_m,),
            in_specs=[
                pl.BlockSpec((tm_eff, D), lambda i: (i, 0)),   # x row-tile
                pl.BlockSpec((D, H), lambda i: (0, 0)),        # W1 (resident)
                pl.BlockSpec((1, H), lambda i: (0, 0)),        # b1 (resident)
                pl.BlockSpec((H, L_pad), lambda i: (0, 0)),    # W2 (resident)
                pl.BlockSpec((1, L_pad), lambda i: (0, 0)),    # b2 (resident)
            ],
            out_specs=pl.BlockSpec((tm_eff, L_pad), lambda i: (i, 0)),
        ),
        compiler_params=pltpu.CompilerParams(
            dimension_semantics=("parallel",),
            vmem_limit_bytes=vmem_limit),
        cost_estimate=cost,
    )(x_c, w1_c, b1_c, w2_c, b2_c)

    return out2d[:M, :L]


def vision_language_bridge(vis_features, w1, b1, w2, b2, *, tm=256):
    """JAX/Pallas equivalent of VisionLanguageBridge.forward (both branches)."""
    if vis_features.ndim == 4:
        assert vis_features.shape[2] == 1
        B, R, _, D = vis_features.shape
        out2d = _bridge_mlp_2d(vis_features.reshape(B * R, D),
                               w1, b1, w2, b2, tm=tm)
        # '(b r) l -> b r l' then unsqueeze(-2)
        return out2d.reshape(B, R, -1)[:, :, None, :]
    else:
        assert vis_features.shape[1] == 1
        x2d = vis_features[:, 0]
        out2d = _bridge_mlp_2d(x2d, w1, b1, w2, b2, tm=tm)
        return out2d[:, None, :]


def _torch_style_linear_init(key, in_features, out_features, dtype=jnp.float32):
    """Deterministic init mimicking nn.Linear's U(-1/sqrt(in), 1/sqrt(in)).

    Returns W as (in_features, out_features) so the kernel can do x @ W.
    """
    kw, kb = jax.random.split(key)
    bound = 1.0 / jnp.sqrt(jnp.float32(in_features))
    w = jax.random.uniform(kw, (in_features, out_features), dtype,
                           minval=-bound, maxval=bound)
    b = jax.random.uniform(kb, (out_features,), dtype,
                           minval=-bound, maxval=bound)
    return w, b


if __name__ == "__main__":
    # Small shapes consistent with the module's 4-D branch.
    B, R, D = 2, 4, 16           # batch, tokens-per-batch, input_size
    H, L = 32, 64                # hidden_size, llm_input_size

    key = jax.random.PRNGKey(0)
    k_x, k_fc, k_proj = jax.random.split(key, 3)

    vis_features = jax.random.normal(k_x, (B, R, 1, D), jnp.float32)
    w1, b1 = _torch_style_linear_init(k_fc, D, H)      # visual_fc Linear
    w2, b2 = _torch_style_linear_init(k_proj, H, L)    # state_token_proj

    out = vision_language_bridge(vis_features, w1, b1, w2, b2)
    out = jax.block_until_ready(out)
    assert out.shape == (B, R, 1, L), out.shape

    # Pure-JAX f32 reference; bf16 MXU inputs => looser tolerance.
    x2d = vis_features.reshape(B * R, D)
    ref = jnp.maximum(x2d @ w1 + b1, 0.0) @ w2 + b2
    ref = ref.reshape(B, R, L)[:, :, None, :]
    assert jnp.allclose(out, ref, atol=3e-2, rtol=3e-2), (
        float(jnp.max(jnp.abs(out - ref))))

    # Also exercise the 3-D branch once.
    vis3 = jax.random.normal(k_x, (B, 1, D), jnp.float32)
    out3 = jax.block_until_ready(vision_language_bridge(vis3, w1, b1, w2, b2))
    ref3 = (jnp.maximum(vis3[:, 0] @ w1 + b1, 0.0) @ w2 + b2)[:, None, :]
    assert out3.shape == (B, 1, L), out3.shape
    assert jnp.allclose(out3, ref3, atol=3e-2, rtol=3e-2)

    print("KERNEL_OK")
</pallas_src>

<mosaic_0001>
module attributes {stable_mosaic.version = 11 : i64} {
  func.func @_bridge_kernel(%arg0: i32, %arg1: memref<16x16xbf16, #tpu.memory_space<vmem>>, %arg2: memref<16x32xbf16, #tpu.memory_space<vmem>>, %arg3: memref<1x32xf32, #tpu.memory_space<vmem>>, %arg4: memref<32x128xbf16, #tpu.memory_space<vmem>>, %arg5: memref<1x128xf32, #tpu.memory_space<vmem>>, %arg6: memref<16x128xf32, #tpu.memory_space<vmem>>) attributes {dimension_semantics = [#tpu.dimension_semantics<parallel>], iteration_bounds = array<i64: 1>, scalar_prefetch = 0 : i64, scratch_operands = 0 : i64, tpu.core_type = #tpu.core_type<tc>, window_params = [{transform_indices = @transform_0, window_bounds = array<i64: 16, 16>}, {pipeline_mode = #tpu.pipeline_mode<synchronous>, transform_indices = @transform_1, window_bounds = array<i64: 16, 32>}, {pipeline_mode = #tpu.pipeline_mode<synchronous>, transform_indices = @transform_2, window_bounds = array<i64: 1, 32>}, {pipeline_mode = #tpu.pipeline_mode<synchronous>, transform_indices = @transform_3, window_bounds = array<i64: 32, 128>}, {pipeline_mode = #tpu.pipeline_mode<synchronous>, transform_indices = @transform_4, window_bounds = array<i64: 1, 128>}, {transform_indices = @transform_5, window_bounds = array<i64: 16, 128>}]} {
    %c0 = arith.constant 0 : index
    %c0_0 = arith.constant 0 : index
    %0 = vector.load %arg1[%c0, %c0_0] : memref<16x16xbf16, #tpu.memory_space<vmem>>, vector<16x16xbf16>
    %c0_1 = arith.constant 0 : index
    %c0_2 = arith.constant 0 : index
    %1 = vector.load %arg2[%c0_1, %c0_2] : memref<16x32xbf16, #tpu.memory_space<vmem>>, vector<16x32xbf16>
    %cst = arith.constant dense<0.000000e+00> : vector<16x32xf32>
    %2 = tpu.matmul %0, %1, %cst {dimension_numbers = #tpu.dot_dimension_numbers<[1], [0], [0], [1], [0, 0, 1, 1], [], []>} : vector<16x16xbf16>, vector<16x32xbf16>, vector<16x32xf32> -> vector<16x32xf32>
    %c0_3 = arith.constant 0 : index
    %c0_4 = arith.constant 0 : index
    %3 = vector.load %arg3[%c0_3, %c0_4] : memref<1x32xf32, #tpu.memory_space<vmem>>, vector<1x32xf32>
    %4 = vector.broadcast %3 : vector<1x32xf32> to vector<16x32xf32>
    %5 = arith.addf %2, %4 : vector<16x32xf32>
    %cst_5 = arith.constant 0.000000e+00 : f32
    %6 = vector.broadcast %cst_5 : f32 to vector<16x32xf32>
    %7 = arith.maximumf %5, %6 : vector<16x32xf32>
    %8 = arith.truncf %7 : vector<16x32xf32> to vector<16x32xbf16>
    %c0_6 = arith.constant 0 : index
    %c0_7 = arith.constant 0 : index
    %9 = vector.load %arg4[%c0_6, %c0_7] : memref<32x128xbf16, #tpu.memory_space<vmem>>, vector<32x128xbf16>
    %cst_8 = arith.constant dense<0.000000e+00> : vector<16x128xf32>
    %10 = tpu.matmul %8, %9, %cst_8 {dimension_numbers = #tpu.dot_dimension_numbers<[1], [0], [0], [1], [0, 0, 1, 1], [], []>} : vector<16x32xbf16>, vector<32x128xbf16>, vector<16x128xf32> -> vector<16x128xf32>
    %c0_9 = arith.constant 0 : index
    %c0_10 = arith.constant 0 : index
    %11 = vector.load %arg5[%c0_9, %c0_10] : memref<1x128xf32, #tpu.memory_space<vmem>>, vector<1x128xf32>
    %12 = vector.broadcast %11 : vector<1x128xf32> to vector<16x128xf32>
    %13 = arith.addf %10, %12 : vector<16x128xf32>
    %c0_11 = arith.constant 0 : index
    %c0_12 = arith.constant 0 : index
    %14 = vector.load %arg6[%c0_11, %c0_12] : memref<16x128xf32, #tpu.memory_space<vmem>>, vector<16x128xf32>
    tpu.vector_store %arg6[%c0_11, %c0_12], %13 {strides = array<i32>} : memref<16x128xf32, #tpu.memory_space<vmem>>, vector<16x128xf32>,
    return
  }
  func.func @transform_0(%arg0: i32) -> (i32, i32) {
    %c0_i32 = arith.constant 0 : i32
    %c0_i32_0 = arith.constant 0 : i32
    return %arg0, %c0_i32 : i32, i32
  }
  func.func @transform_1(%arg0: i32) -> (i32, i32) {
    %c0_i32 = arith.constant 0 : i32
    %c0_i32_0 = arith.constant 0 : i32
    %c0_i32_1 = arith.constant 0 : i32
    return %c0_i32, %c0_i32_0 : i32, i32
  }
  func.func @transform_2(%arg0: i32) -> (i32, i32) {
    %c0_i32 = arith.constant 0 : i32
    %c0_i32_0 = arith.constant 0 : i32
    %c0_i32_1 = arith.constant 0 : i32
    return %c0_i32, %c0_i32_0 : i32, i32
  }
  func.func @transform_3(%arg0: i32) -> (i32, i32) {
    %c0_i32 = arith.constant 0 : i32
    %c0_i32_0 = arith.constant 0 : i32
    %c0_i32_1 = arith.constant 0 : i32
    return %c0_i32, %c0_i32_0 : i32, i32
  }
  func.func @transform_4(%arg0: i32) -> (i32, i32) {
    %c0_i32 = arith.constant 0 : i32
    %c0_i32_0 = arith.constant 0 : i32
    %c0_i32_1 = arith.constant 0 : i32
    return %c0_i32, %c0_i32_0 : i32, i32
  }
  func.func @transform_5(%arg0: i32) -> (i32, i32) {
    %c0_i32 = arith.constant 0 : i32
    %c0_i32_0 = arith.constant 0 : i32
    return %arg0, %c0_i32 : i32, i32
  }
}

</mosaic_0001>

<bundles_post_ra>
// kernel: _bridge_mlp_2d.1
= control target key start
LH: loop header
LB: loop body
LE: loop exit
PB: predicated region body
PF: predicated region fallthrough
CT: control target
= control target key end

     0   :  { %v198_v0 = vmov 0.0   ;;  %vm199_vm0 = vmmov 0   ;;  %vm43_vm1 = vcmask 130048   ;;  %vm114_vm2 = vcmask 261120   ;;  %s254_s1 = inlined_call_operand.vmem [shape: bf16[16,32], index: 1, kind: input, shape index: {}]   ;;  %s255_s0 = inlined_call_operand.vmem [shape: bf16[16,16], index: 0, kind: input, shape index: {}]   ;;  %s256_s3 = inlined_call_operand.vmem [shape: bf16[32,128], index: 3, kind: input, shape index: {}]   ;;  %s257_s2 = inlined_call_operand.vmem [shape: f32[1,32], index: 2, kind: input, shape index: {}]   ;;  %s258_s4 = inlined_call_operand.vmem [shape: f32[1,128], index: 4, kind: input, shape index: {}]   ;;  %s259_s5 = inlined_call_operand.vmem [shape: f32[16,128], index: 5, kind: output, shape index: {}]  }
   0x1   :  { %178 = vmatprep.subr.bf16.mxu0 %v198_v0  ;;  %v194_v1 = vld [vmem:[%s254_s1] sm:$0xff]   ;;  %180 = vmatprep.mubr.msk.bf16.mxu0 %vm199_vm0, %v198_v0  ;;  %v196_v3 = vld [vmem:[%s256_s3 + $0x8] sm:$0xff]  }
   0x2   :  { %v195_v2 = vld [vmem:[%s255_s0] sm:$0xff]   ;;  %184 = vmatprep.subr.bf16.mxu1 %v198_v0  ;;  %188 = vmatprep.mubr.msk.bf16.mxu1 %vm199_vm0, %v198_v0 }
   0x3   :  { %179 = vmatpush3.bf16.msra.mxu0 %v194_v1  ;;  %185 = vmatpush3.bf16.msra.mxu1 %v196_v3  ;;  %v197_v4 = vld [vmem:[%s256_s3] sm:$0xff]  }
   0x4   :  { %186 = vmatprep.subr.bf16.mxu1 %v198_v0  ;;  %v165_v5 = vld [vmem:[%s257_s2] ss:$0 sm:$0xff] }
   0x5   :  { %v169_v15 = vld [vmem:[%s258_s4] ss:$0 sm:$0xff] }
   0x6   :  { %181 = vmatmul.mubr.msk.bf16.vlgmr.msra.gmra.mxu0 %vm43_vm1, %v195_v2 }
   0x7   :  { %187 = vmatpush3.bf16.msra.mxu1 %v197_v4 }
  0xc6   :  { %v81_v6 = vpop.f32.mrf.mxu0 }
  0xc7   :  { %v82_v8 = vadd.f32 %v165_v5, %v81_v6 }
  0xc8   :  { %v182_v7 = vpop.f32.mrf.mxu0 }
  0xc9   :  { %v88_v12 = vmax.f32 %v82_v8, 0.0 }
  0xca   :  { %v84_v9 = vpop.f32.mrf.mxu0 }
  0xcb   :  { %v85_v10 = vadd.f32 %v165_v5, %v84_v9 }
  0xcc   :  { %v183_v11 = vpop.f32.mrf.mxu0 }
  0xcd   :  { %v89_v13 = vmax.f32 %v85_v10, 0.0 }
  0xcf   :  { %v90_v14 = vpack.c.bf16 %v89_v13, %v88_v12 }
  0xd1   :  { %189 = vmatmul.mubr.msk.bf16.vlgmr.msra.gmra.mxu1 %vm114_vm2, %v90_v14 }
 0x191   :  { %v152_v16 = vpop.f32.mrf.mxu1 }
 0x192   :  { %v153_v17 = vadd.f32 %v169_v15, %v152_v16 }
 0x193   :  { %v190_v18 = vpop.f32.mrf.mxu1 }
 0x194   :  { %159 = vst [vmem:[%s259_s5] sm:$0xff] %v153_v17 }
 0x195   :  { %v155_v19 = vpop.f32.mrf.mxu1 }
 0x196   :  { %v156_v20 = vadd.f32 %v169_v15, %v155_v19 }
 0x197   :  { %v191_v21 = vpop.f32.mrf.mxu1 }
 0x198   :  { %160 = vst [vmem:[%s259_s5 + $0x8] sm:$0xff] %v156_v20 }

</bundles_post_ra>
